<compile_context>
chip_gen: v5e
topology: v5e:2x2
jax: 0.10.0
libtpu: 0.0.40
codegen_flags: <defaults>
</compile_context>

<pallas_src>
import functools

import jax
import jax.numpy as jnp
from jax.experimental import pallas as pl
from jax.experimental.pallas import tpu as pltpu


HEAD_WIDTH = 128  # lane-dense packed head output width


# ----------------------------- Pallas kernel --------------------------------

def _scatter_cols(vals, col_offset, total_cols):
    """Place vals (N, K) into columns [col_offset, col_offset+K) of an
    (N, total_cols) zero slab via a tiny selection matmul (layout-safe)."""
    k = vals.shape[1]
    rows = jax.lax.broadcasted_iota(jnp.int32, (k, total_cols), 0)
    cols = jax.lax.broadcasted_iota(jnp.int32, (k, total_cols), 1)
    sel = (cols == rows + col_offset).astype(jnp.float32)
    return jnp.dot(vals, sel, preferred_element_type=jnp.float32)


def gcnnet_nc_fused_kernel(*refs, num_layers, epsilon, emb_normalize,
                           n_classes, n_protos):
    del n_protos  # shape comes from the prototype ref itself
    a_ref, x_ref = refs[0], refs[1]
    w_refs = refs[2:2 + num_layers]
    b_refs = refs[2 + num_layers:2 + 2 * num_layers]
    proto_t_ref = refs[2 + 2 * num_layers]        # (D, P)  f32
    lw_t_ref = refs[3 + 2 * num_layers]           # (P, C)  f32
    emb_ref = refs[4 + 2 * num_layers]            # (N, D)  f32 out
    head_ref = refs[5 + 2 * num_layers]           # (N, 128) f32 out

    a = a_ref[...]                                # (N, N)   bf16
    h = x_ref[...]                                # (N, Fin) bf16
    emb_f32 = None

    for li in range(num_layers):
        # (A @ H) @ W : contract the NxN aggregation over Fin (<= Fout).
        agg = jnp.dot(a, h, preferred_element_type=jnp.float32)
        out = jnp.dot(agg.astype(jnp.bfloat16), w_refs[li][...],
                      preferred_element_type=jnp.float32) + b_refs[li][...]
        if emb_normalize:
            nrm2 = jnp.sum(out * out, axis=-1, keepdims=True)
            out = out * jax.lax.rsqrt(jnp.maximum(nrm2, 1e-24))
        out = jnp.maximum(out, 0.0)               # ReLU (gnn_non_linear)
        h = out.astype(jnp.bfloat16)
        emb_f32 = out                             # f32 copy of last layer

    emb_ref[...] = emb_f32

    # ----------------------------- prototype head ---------------------------
    proto_t = proto_t_ref[...]                                      # (D, P) f32
    xp = jnp.dot(h, proto_t.astype(jnp.bfloat16),
                 preferred_element_type=jnp.float32)                # (N, P)
    x2 = jnp.sum(emb_f32 * emb_f32, axis=1, keepdims=True)          # (N, 1)
    p2 = jnp.sum(proto_t * proto_t, axis=0, keepdims=True)          # (1, P)
    dist = jnp.maximum(-2.0 * xp + x2 + p2, 0.0)                    # (N, P)
    sim = jnp.log((dist + 1.0) * pl.reciprocal(dist + epsilon, approx=True))
    logits = jnp.dot(sim, lw_t_ref[...],
                     preferred_element_type=jnp.float32)            # (N, C)
    m = jnp.max(logits, axis=-1, keepdims=True)
    e = jnp.exp(logits - m)
    probs = e * pl.reciprocal(jnp.sum(e, axis=-1, keepdims=True), approx=True)

    # Lane-dense packed slab: [logits | probs | dist | zero-pad] -> (N, 128).
    head_ref[...] = (_scatter_cols(logits, 0, HEAD_WIDTH)
                     + _scatter_cols(probs, n_classes, HEAD_WIDTH)
                     + _scatter_cols(dist, 2 * n_classes, HEAD_WIDTH))


# ------------------------------ Pallas wrapper -------------------------------

def _full_spec(shape):
    return pl.BlockSpec(shape, lambda i: (0,) * len(shape))


def gcnnet_nc_forward(params, x, edge_index, *, emb_normalize=False,
                      concate=False, epsilon=1e-4):
    assert not concate, "concate=True only pairs with the MLP head (not impl)"
    n = x.shape[0]
    a_norm = build_norm_adj(edge_index, n).astype(jnp.bfloat16)

    w_list = [w.astype(jnp.bfloat16) for w in params["gnn_w"]]
    b_list = [b.reshape(1, -1).astype(jnp.float32) for b in params["gnn_b"]]
    proto = params["prototype_vectors"]                      # (P, D) f32
    last_w = params["last_w"]                                # (C, P) f32
    num_layers = len(w_list)
    d = w_list[-1].shape[1]
    p_cnt = proto.shape[0]
    c_cnt = last_w.shape[0]
    assert 2 * c_cnt + p_cnt <= HEAD_WIDTH

    proto_t = jnp.transpose(proto).astype(jnp.float32)       # (D, P)
    lw_t = jnp.transpose(last_w).astype(jnp.float32)         # (P, C)
    x_bf = x.astype(jnp.bfloat16)

    inputs = [a_norm, x_bf] + w_list + b_list + [proto_t, lw_t]
    in_specs = [_full_spec(t.shape) for t in inputs]

    kern = functools.partial(
        gcnnet_nc_fused_kernel, num_layers=num_layers, epsilon=epsilon,
        emb_normalize=emb_normalize, n_classes=c_cnt, n_protos=p_cnt)

    emb, head = pl.pallas_call(
        kern,
        grid=(1,),
        in_specs=in_specs,
        out_specs=[_full_spec((n, d)), _full_spec((n, HEAD_WIDTH))],
        out_shape=(jax.ShapeDtypeStruct((n, d), jnp.float32),
                   jax.ShapeDtypeStruct((n, HEAD_WIDTH), jnp.float32)),
        compiler_params=pltpu.CompilerParams(
            dimension_semantics=("arbitrary",)),
    )(*inputs)

    logits = head[:, :c_cnt]
    probs = head[:, c_cnt:2 * c_cnt]
    min_distances = head[:, 2 * c_cnt:2 * c_cnt + p_cnt]
    return logits, probs, emb, min_distances


# ------------------------------ glue (plain JAX) -----------------------------

def build_norm_adj(edge_index, num_nodes):
    """GCN symmetric normalization: D^{-1/2} (A + I) D^{-1/2}, dense."""
    src, dst = edge_index[0], edge_index[1]
    a = jnp.zeros((num_nodes, num_nodes), jnp.float32)
    a = a.at[dst, src].set(1.0)                                  # src -> dst
    a = jnp.maximum(a, jnp.eye(num_nodes, dtype=jnp.float32))    # self loops
    deg = jnp.sum(a, axis=1)
    dinv = jnp.where(deg > 0, 1.0 / jnp.sqrt(deg), 0.0)
    return dinv[:, None] * a * dinv[None, :]


def init_params(key, input_dim, latent_dim, output_dim, num_prototypes_per_class):
    params = {}
    gnn_w, gnn_b = [], []
    dims = [input_dim] + list(latent_dim)
    for i in range(len(latent_dim)):
        key, k = jax.random.split(key)
        fin, fout = dims[i], dims[i + 1]
        s = (6.0 / (fin + fout)) ** 0.5
        gnn_w.append(jax.random.uniform(k, (fin, fout), jnp.float32, -s, s))
        gnn_b.append(jnp.zeros((fout,), jnp.float32))
    params["gnn_w"], params["gnn_b"] = gnn_w, gnn_b

    num_prototypes = output_dim * num_prototypes_per_class
    key, k = jax.random.split(key)
    # torch.rand -> uniform [0, 1)
    params["prototype_vectors"] = jax.random.uniform(
        k, (num_prototypes, 128), jnp.float32)

    # prototype_class_identity + set_last_layer_incorrect_connection(-0.5)
    proto_class = jnp.zeros((num_prototypes, output_dim), jnp.float32)
    proto_class = proto_class.at[
        jnp.arange(num_prototypes),
        jnp.arange(num_prototypes) // num_prototypes_per_class].set(1.0)
    pos = proto_class.T                                       # (C, P)
    params["last_w"] = 1.0 * pos + (-0.5) * (1.0 - pos)
    return params


# ----------------------------------- main ------------------------------------

if __name__ == "__main__":
    key = jax.random.PRNGKey(0)

    num_nodes = 16
    input_dim = 8
    latent_dim = [32, 32, 128]      # dense_dim = 128 must match prototype dim
    output_dim = 4
    num_prototypes_per_class = 2
    num_edges = 40

    key, kx, ke1, ke2 = jax.random.split(key, 4)
    x = jax.random.normal(kx, (num_nodes, input_dim), jnp.float32)
    src = jax.random.randint(ke1, (num_edges,), 0, num_nodes)
    dst = jax.random.randint(ke2, (num_edges,), 0, num_nodes)
    edge_index = jnp.stack([src, dst], axis=0)

    params = init_params(key, input_dim, latent_dim, output_dim,
                         num_prototypes_per_class)

    logits, probs, emb, min_dist = gcnnet_nc_forward(
        params, x, edge_index, emb_normalize=False, concate=False)
    jax.block_until_ready((logits, probs, emb, min_dist))

    assert logits.shape == (num_nodes, output_dim)
    assert probs.shape == (num_nodes, output_dim)
    assert emb.shape == (num_nodes, latent_dim[-1])
    assert min_dist.shape == (num_nodes, output_dim * num_prototypes_per_class)
    assert bool(jnp.all(jnp.isfinite(logits)))
    assert bool(jnp.all(jnp.isfinite(probs)))
    assert bool(jnp.all(jnp.isfinite(min_dist)))
    assert bool(jnp.all(min_dist >= 0.0))
    assert bool(jnp.all(jnp.abs(jnp.sum(probs, axis=-1) - 1.0) < 1e-2))

    print("KERNEL_OK")
</pallas_src>

<mosaic_0001>
module attributes {stable_mosaic.version = 11 : i64} {
  func.func @gcnnet_nc_fused_kernel(%arg0: i32, %arg1: memref<16x16xbf16, #tpu.memory_space<vmem>>, %arg2: memref<16x8xbf16, #tpu.memory_space<vmem>>, %arg3: memref<8x32xbf16, #tpu.memory_space<vmem>>, %arg4: memref<32x32xbf16, #tpu.memory_space<vmem>>, %arg5: memref<32x128xbf16, #tpu.memory_space<vmem>>, %arg6: memref<1x32xf32, #tpu.memory_space<vmem>>, %arg7: memref<1x32xf32, #tpu.memory_space<vmem>>, %arg8: memref<1x128xf32, #tpu.memory_space<vmem>>, %arg9: memref<128x8xf32, #tpu.memory_space<vmem>>, %arg10: memref<8x4xf32, #tpu.memory_space<vmem>>, %arg11: memref<16x128xf32, #tpu.memory_space<vmem>>, %arg12: memref<16x128xf32, #tpu.memory_space<vmem>>) attributes {dimension_semantics = [#tpu.dimension_semantics<arbitrary>], iteration_bounds = array<i64: 1>, scalar_prefetch = 0 : i64, scratch_operands = 0 : i64, tpu.core_type = #tpu.core_type<tc>, window_params = [{pipeline_mode = #tpu.pipeline_mode<synchronous>, transform_indices = @transform_0, window_bounds = array<i64: 16, 16>}, {pipeline_mode = #tpu.pipeline_mode<synchronous>, transform_indices = @transform_1, window_bounds = array<i64: 16, 8>}, {pipeline_mode = #tpu.pipeline_mode<synchronous>, transform_indices = @transform_2, window_bounds = array<i64: 8, 32>}, {pipeline_mode = #tpu.pipeline_mode<synchronous>, transform_indices = @transform_3, window_bounds = array<i64: 32, 32>}, {pipeline_mode = #tpu.pipeline_mode<synchronous>, transform_indices = @transform_4, window_bounds = array<i64: 32, 128>}, {pipeline_mode = #tpu.pipeline_mode<synchronous>, transform_indices = @transform_5, window_bounds = array<i64: 1, 32>}, {pipeline_mode = #tpu.pipeline_mode<synchronous>, transform_indices = @transform_6, window_bounds = array<i64: 1, 32>}, {pipeline_mode = #tpu.pipeline_mode<synchronous>, transform_indices = @transform_7, window_bounds = array<i64: 1, 128>}, {pipeline_mode = #tpu.pipeline_mode<synchronous>, transform_indices = @transform_8, window_bounds = array<i64: 128, 8>}, {pipeline_mode = #tpu.pipeline_mode<synchronous>, transform_indices = @transform_9, window_bounds = array<i64: 8, 4>}, {pipeline_mode = #tpu.pipeline_mode<synchronous>, transform_indices = @transform_10, window_bounds = array<i64: 16, 128>}, {pipeline_mode = #tpu.pipeline_mode<synchronous>, transform_indices = @transform_11, window_bounds = array<i64: 16, 128>}]} {
    %c0 = arith.constant 0 : index
    %c0_0 = arith.constant 0 : index
    %0 = vector.load %arg1[%c0, %c0_0] : memref<16x16xbf16, #tpu.memory_space<vmem>>, vector<16x16xbf16>
    %c0_1 = arith.constant 0 : index
    %c0_2 = arith.constant 0 : index
    %1 = vector.load %arg2[%c0_1, %c0_2] : memref<16x8xbf16, #tpu.memory_space<vmem>>, vector<16x8xbf16>
    %cst = arith.constant dense<0.000000e+00> : vector<16x8xf32>
    %2 = tpu.matmul %0, %1, %cst {dimension_numbers = #tpu.dot_dimension_numbers<[1], [0], [0], [1], [0, 0, 1, 1], [], []>} : vector<16x16xbf16>, vector<16x8xbf16>, vector<16x8xf32> -> vector<16x8xf32>
    %3 = arith.truncf %2 : vector<16x8xf32> to vector<16x8xbf16>
    %c0_3 = arith.constant 0 : index
    %c0_4 = arith.constant 0 : index
    %4 = vector.load %arg3[%c0_3, %c0_4] : memref<8x32xbf16, #tpu.memory_space<vmem>>, vector<8x32xbf16>
    %cst_5 = arith.constant dense<0.000000e+00> : vector<16x32xf32>
    %5 = tpu.matmul %3, %4, %cst_5 {dimension_numbers = #tpu.dot_dimension_numbers<[1], [0], [0], [1], [0, 0, 1, 1], [], []>} : vector<16x8xbf16>, vector<8x32xbf16>, vector<16x32xf32> -> vector<16x32xf32>
    %c0_6 = arith.constant 0 : index
    %c0_7 = arith.constant 0 : index
    %6 = vector.load %arg6[%c0_6, %c0_7] : memref<1x32xf32, #tpu.memory_space<vmem>>, vector<1x32xf32>
    %7 = vector.broadcast %6 : vector<1x32xf32> to vector<16x32xf32>
    %8 = arith.addf %5, %7 : vector<16x32xf32>
    %cst_8 = arith.constant 0.000000e+00 : f32
    %9 = vector.broadcast %cst_8 : f32 to vector<16x32xf32>
    %10 = arith.maximumf %8, %9 : vector<16x32xf32>
    %11 = arith.truncf %10 : vector<16x32xf32> to vector<16x32xbf16>
    %cst_9 = arith.constant dense<0.000000e+00> : vector<16x32xf32>
    %12 = tpu.matmul %0, %11, %cst_9 {dimension_numbers = #tpu.dot_dimension_numbers<[1], [0], [0], [1], [0, 0, 1, 1], [], []>} : vector<16x16xbf16>, vector<16x32xbf16>, vector<16x32xf32> -> vector<16x32xf32>
    %13 = arith.truncf %12 : vector<16x32xf32> to vector<16x32xbf16>
    %c0_10 = arith.constant 0 : index
    %c0_11 = arith.constant 0 : index
    %14 = vector.load %arg4[%c0_10, %c0_11] : memref<32x32xbf16, #tpu.memory_space<vmem>>, vector<32x32xbf16>
    %cst_12 = arith.constant dense<0.000000e+00> : vector<16x32xf32>
    %15 = tpu.matmul %13, %14, %cst_12 {dimension_numbers = #tpu.dot_dimension_numbers<[1], [0], [0], [1], [0, 0, 1, 1], [], []>} : vector<16x32xbf16>, vector<32x32xbf16>, vector<16x32xf32> -> vector<16x32xf32>
    %c0_13 = arith.constant 0 : index
    %c0_14 = arith.constant 0 : index
    %16 = vector.load %arg7[%c0_13, %c0_14] : memref<1x32xf32, #tpu.memory_space<vmem>>, vector<1x32xf32>
    %17 = vector.broadcast %16 : vector<1x32xf32> to vector<16x32xf32>
    %18 = arith.addf %15, %17 : vector<16x32xf32>
    %cst_15 = arith.constant 0.000000e+00 : f32
    %19 = vector.broadcast %cst_15 : f32 to vector<16x32xf32>
    %20 = arith.maximumf %18, %19 : vector<16x32xf32>
    %21 = arith.truncf %20 : vector<16x32xf32> to vector<16x32xbf16>
    %cst_16 = arith.constant dense<0.000000e+00> : vector<16x32xf32>
    %22 = tpu.matmul %0, %21, %cst_16 {dimension_numbers = #tpu.dot_dimension_numbers<[1], [0], [0], [1], [0, 0, 1, 1], [], []>} : vector<16x16xbf16>, vector<16x32xbf16>, vector<16x32xf32> -> vector<16x32xf32>
    %23 = arith.truncf %22 : vector<16x32xf32> to vector<16x32xbf16>
    %c0_17 = arith.constant 0 : index
    %c0_18 = arith.constant 0 : index
    %24 = vector.load %arg5[%c0_17, %c0_18] : memref<32x128xbf16, #tpu.memory_space<vmem>>, vector<32x128xbf16>
    %cst_19 = arith.constant dense<0.000000e+00> : vector<16x128xf32>
    %25 = tpu.matmul %23, %24, %cst_19 {dimension_numbers = #tpu.dot_dimension_numbers<[1], [0], [0], [1], [0, 0, 1, 1], [], []>} : vector<16x32xbf16>, vector<32x128xbf16>, vector<16x128xf32> -> vector<16x128xf32>
    %c0_20 = arith.constant 0 : index
    %c0_21 = arith.constant 0 : index
    %26 = vector.load %arg8[%c0_20, %c0_21] : memref<1x128xf32, #tpu.memory_space<vmem>>, vector<1x128xf32>
    %27 = vector.broadcast %26 : vector<1x128xf32> to vector<16x128xf32>
    %28 = arith.addf %25, %27 : vector<16x128xf32>
    %cst_22 = arith.constant 0.000000e+00 : f32
    %29 = vector.broadcast %cst_22 : f32 to vector<16x128xf32>
    %30 = arith.maximumf %28, %29 : vector<16x128xf32>
    %31 = arith.truncf %30 : vector<16x128xf32> to vector<16x128xbf16>
    %c0_23 = arith.constant 0 : index
    %c0_24 = arith.constant 0 : index
    %32 = vector.load %arg11[%c0_23, %c0_24] : memref<16x128xf32, #tpu.memory_space<vmem>>, vector<16x128xf32>
    tpu.vector_store %arg11[%c0_23, %c0_24], %30 {strides = array<i32>} : memref<16x128xf32, #tpu.memory_space<vmem>>, vector<16x128xf32>,
    %c0_25 = arith.constant 0 : index
    %c0_26 = arith.constant 0 : index
    %33 = vector.load %arg9[%c0_25, %c0_26] : memref<128x8xf32, #tpu.memory_space<vmem>>, vector<128x8xf32>
    %34 = arith.truncf %33 : vector<128x8xf32> to vector<128x8xbf16>
    %cst_27 = arith.constant dense<0.000000e+00> : vector<16x8xf32>
    %35 = tpu.matmul %31, %34, %cst_27 {dimension_numbers = #tpu.dot_dimension_numbers<[1], [0], [0], [1], [0, 0, 1, 1], [], []>} : vector<16x128xbf16>, vector<128x8xbf16>, vector<16x8xf32> -> vector<16x8xf32>
    %36 = arith.mulf %30, %30 : vector<16x128xf32>
    %cst_28 = arith.constant dense<0.000000e+00> : vector<16xf32>
    %37 = vector.multi_reduction <add>, %36, %cst_28 [1] : vector<16x128xf32> to vector<16xf32>
    %38 = vector.shape_cast %37 : vector<16xf32> to vector<16x1xf32>
    %39 = arith.mulf %33, %33 : vector<128x8xf32>
    %cst_29 = arith.constant dense<0.000000e+00> : vector<8xf32>
    %40 = vector.multi_reduction <add>, %39, %cst_29 [0] : vector<128x8xf32> to vector<8xf32>
    %41 = vector.shape_cast %40 : vector<8xf32> to vector<1x8xf32>
    %cst_30 = arith.constant -2.000000e+00 : f32
    %42 = vector.broadcast %cst_30 : f32 to vector<16x8xf32>
    %43 = arith.mulf %42, %35 : vector<16x8xf32>
    %44 = vector.broadcast %38 : vector<16x1xf32> to vector<16x8xf32>
    %45 = arith.addf %43, %44 : vector<16x8xf32>
    %46 = vector.broadcast %41 : vector<1x8xf32> to vector<16x8xf32>
    %47 = arith.addf %45, %46 : vector<16x8xf32>
    %cst_31 = arith.constant 0.000000e+00 : f32
    %48 = vector.broadcast %cst_31 : f32 to vector<16x8xf32>
    %49 = arith.maximumf %47, %48 : vector<16x8xf32>
    %cst_32 = arith.constant 1.000000e+00 : f32
    %50 = vector.broadcast %cst_32 : f32 to vector<16x8xf32>
    %51 = arith.addf %49, %50 : vector<16x8xf32>
    %cst_33 = arith.constant 9.99999974E-5 : f32
    %52 = vector.broadcast %cst_33 : f32 to vector<16x8xf32>
    %53 = arith.addf %49, %52 : vector<16x8xf32>
    %54 = tpu.reciprocal %53 {approx = true} : vector<16x8xf32> -> vector<16x8xf32>
    %55 = arith.mulf %51, %54 : vector<16x8xf32>
    %56 = math.log %55 : vector<16x8xf32>
    %c0_34 = arith.constant 0 : index
    %c0_35 = arith.constant 0 : index
    %57 = vector.load %arg10[%c0_34, %c0_35] : memref<8x4xf32, #tpu.memory_space<vmem>>, vector<8x4xf32>
    %cst_36 = arith.constant dense<0.000000e+00> : vector<16x4xf32>
    %58 = tpu.matmul %56, %57, %cst_36 {dimension_numbers = #tpu.dot_dimension_numbers<[1], [0], [0], [1], [0, 0, 1, 1], [], []>} : vector<16x8xf32>, vector<8x4xf32>, vector<16x4xf32> -> vector<16x4xf32>
    %cst_37 = arith.constant dense<0xFF800000> : vector<16xf32>
    %59 = vector.multi_reduction <maximumf>, %58, %cst_37 [1] : vector<16x4xf32> to vector<16xf32>
    %60 = vector.shape_cast %59 : vector<16xf32> to vector<16x1xf32>
    %61 = vector.broadcast %60 : vector<16x1xf32> to vector<16x4xf32>
    %62 = arith.subf %58, %61 : vector<16x4xf32>
    %63 = math.exp %62 : vector<16x4xf32>
    %cst_38 = arith.constant dense<0.000000e+00> : vector<16xf32>
    %64 = vector.multi_reduction <add>, %63, %cst_38 [1] : vector<16x4xf32> to vector<16xf32>
    %65 = vector.shape_cast %64 : vector<16xf32> to vector<16x1xf32>
    %66 = tpu.reciprocal %65 {approx = true} : vector<16x1xf32> -> vector<16x1xf32>
    %67 = vector.broadcast %66 : vector<16x1xf32> to vector<16x4xf32>
    %68 = arith.mulf %63, %67 : vector<16x4xf32>
    %69 = tpu.iota {dimensions = array<i32: 0>} : vector<4x128xi32>
    %70 = tpu.iota {dimensions = array<i32: 1>} : vector<4x128xi32>
    %c0_i32 = arith.constant 0 : i32
    %71 = vector.broadcast %c0_i32 : i32 to vector<4x128xi32>
    %72 = arith.addi %69, %71 : vector<4x128xi32>
    %73 = arith.cmpi eq, %70, %72 : vector<4x128xi32>
    %74 = arith.extui %73 : vector<4x128xi1> to vector<4x128xi32>
    %75 = arith.sitofp %74 : vector<4x128xi32> to vector<4x128xf32>
    %cst_39 = arith.constant dense<0.000000e+00> : vector<16x128xf32>
    %76 = tpu.matmul %58, %75, %cst_39 {dimension_numbers = #tpu.dot_dimension_numbers<[1], [0], [0], [1], [0, 0, 1, 1], [], []>} : vector<16x4xf32>, vector<4x128xf32>, vector<16x128xf32> -> vector<16x128xf32>
    %77 = tpu.iota {dimensions = array<i32: 0>} : vector<4x128xi32>
    %78 = tpu.iota {dimensions = array<i32: 1>} : vector<4x128xi32>
    %c4_i32 = arith.constant 4 : i32
    %79 = vector.broadcast %c4_i32 : i32 to vector<4x128xi32>
    %80 = arith.addi %77, %79 : vector<4x128xi32>
    %81 = arith.cmpi eq, %78, %80 : vector<4x128xi32>
    %82 = arith.extui %81 : vector<4x128xi1> to vector<4x128xi32>
    %83 = arith.sitofp %82 : vector<4x128xi32> to vector<4x128xf32>
    %cst_40 = arith.constant dense<0.000000e+00> : vector<16x128xf32>
    %84 = tpu.matmul %68, %83, %cst_40 {dimension_numbers = #tpu.dot_dimension_numbers<[1], [0], [0], [1], [0, 0, 1, 1], [], []>} : vector<16x4xf32>, vector<4x128xf32>, vector<16x128xf32> -> vector<16x128xf32>
    %85 = arith.addf %76, %84 : vector<16x128xf32>
    %86 = tpu.iota {dimensions = array<i32: 0>} : vector<8x128xi32>
    %87 = tpu.iota {dimensions = array<i32: 1>} : vector<8x128xi32>
    %c8_i32 = arith.constant 8 : i32
    %88 = vector.broadcast %c8_i32 : i32 to vector<8x128xi32>
    %89 = arith.addi %86, %88 : vector<8x128xi32>
    %90 = arith.cmpi eq, %87, %89 : vector<8x128xi32>
    %91 = arith.extui %90 : vector<8x128xi1> to vector<8x128xi32>
    %92 = arith.sitofp %91 : vector<8x128xi32> to vector<8x128xf32>
    %cst_41 = arith.constant dense<0.000000e+00> : vector<16x128xf32>
    %93 = tpu.matmul %49, %92, %cst_41 {dimension_numbers = #tpu.dot_dimension_numbers<[1], [0], [0], [1], [0, 0, 1, 1], [], []>} : vector<16x8xf32>, vector<8x128xf32>, vector<16x128xf32> -> vector<16x128xf32>
    %94 = arith.addf %85, %93 : vector<16x128xf32>
    %c0_42 = arith.constant 0 : index
    %c0_43 = arith.constant 0 : index
    %95 = vector.load %arg12[%c0_42, %c0_43] : memref<16x128xf32, #tpu.memory_space<vmem>>, vector<16x128xf32>
    tpu.vector_store %arg12[%c0_42, %c0_43], %94 {strides = array<i32>} : memref<16x128xf32, #tpu.memory_space<vmem>>, vector<16x128xf32>,
    return
  }
  func.func @transform_0(%arg0: i32) -> (i32, i32) {
    %c0_i32 = arith.constant 0 : i32
    %c0_i32_0 = arith.constant 0 : i32
    %c0_i32_1 = arith.constant 0 : i32
    return %c0_i32, %c0_i32_0 : i32, i32
  }
  func.func @transform_1(%arg0: i32) -> (i32, i32) {
    %c0_i32 = arith.constant 0 : i32
    %c0_i32_0 = arith.constant 0 : i32
    %c0_i32_1 = arith.constant 0 : i32
    return %c0_i32, %c0_i32_0 : i32, i32
  }
  func.func @transform_2(%arg0: i32) -> (i32, i32) {
    %c0_i32 = arith.constant 0 : i32
    %c0_i32_0 = arith.constant 0 : i32
    %c0_i32_1 = arith.constant 0 : i32
    return %c0_i32, %c0_i32_0 : i32, i32
  }
  func.func @transform_3(%arg0: i32) -> (i32, i32) {
    %c0_i32 = arith.constant 0 : i32
    %c0_i32_0 = arith.constant 0 : i32
    %c0_i32_1 = arith.constant 0 : i32
    return %c0_i32, %c0_i32_0 : i32, i32
  }
  func.func @transform_4(%arg0: i32) -> (i32, i32) {
    %c0_i32 = arith.constant 0 : i32
    %c0_i32_0 = arith.constant 0 : i32
    %c0_i32_1 = arith.constant 0 : i32
    return %c0_i32, %c0_i32_0 : i32, i32
  }
  func.func @transform_5(%arg0: i32) -> (i32, i32) {
    %c0_i32 = arith.constant 0 : i32
    %c0_i32_0 = arith.constant 0 : i32
    %c0_i32_1 = arith.constant 0 : i32
    return %c0_i32, %c0_i32_0 : i32, i32
  }
  func.func @transform_6(%arg0: i32) -> (i32, i32) {
    %c0_i32 = arith.constant 0 : i32
    %c0_i32_0 = arith.constant 0 : i32
    %c0_i32_1 = arith.constant 0 : i32
    return %c0_i32, %c0_i32_0 : i32, i32
  }
  func.func @transform_7(%arg0: i32) -> (i32, i32) {
    %c0_i32 = arith.constant 0 : i32
    %c0_i32_0 = arith.constant 0 : i32
    %c0_i32_1 = arith.constant 0 : i32
    return %c0_i32, %c0_i32_0 : i32, i32
  }
  func.func @transform_8(%arg0: i32) -> (i32, i32) {
    %c0_i32 = arith.constant 0 : i32
    %c0_i32_0 = arith.constant 0 : i32
    %c0_i32_1 = arith.constant 0 : i32
    return %c0_i32, %c0_i32_0 : i32, i32
  }
  func.func @transform_9(%arg0: i32) -> (i32, i32) {
    %c0_i32 = arith.constant 0 : i32
    %c0_i32_0 = arith.constant 0 : i32
    %c0_i32_1 = arith.constant 0 : i32
    return %c0_i32, %c0_i32_0 : i32, i32
  }
  func.func @transform_10(%arg0: i32) -> (i32, i32) {
    %c0_i32 = arith.constant 0 : i32
    %c0_i32_0 = arith.constant 0 : i32
    %c0_i32_1 = arith.constant 0 : i32
    return %c0_i32, %c0_i32_0 : i32, i32
  }
  func.func @transform_11(%arg0: i32) -> (i32, i32) {
    %c0_i32 = arith.constant 0 : i32
    %c0_i32_0 = arith.constant 0 : i32
    %c0_i32_1 = arith.constant 0 : i32
    return %c0_i32, %c0_i32_0 : i32, i32
  }
}

</mosaic_0001>

<bundles_post_ra>
// kernel: tpu_custom_call.1
= control target key start
LH: loop header
LB: loop body
LE: loop exit
PB: predicated region body
PF: predicated region fallthrough
CT: control target
= control target key end

     0   :  { %17 = vsyncpa [#allocation3], 0  ;;  %s882_s0 = inlined_call_operand.vmem [shape: bf16[16,16], index: 0, kind: input, shape index: {}]   ;;  %s883_s1 = inlined_call_operand.vmem [shape: bf16[16,8], index: 1, kind: input, shape index: {}]   ;;  %s884_s2 = inlined_call_operand.vmem [shape: bf16[8,32], index: 2, kind: input, shape index: {}]   ;;  %s885_s3 = inlined_call_operand.vmem [shape: bf16[32,32], index: 3, kind: input, shape index: {}]   ;;  %s886_s4 = inlined_call_operand.vmem [shape: bf16[32,128], index: 4, kind: input, shape index: {}]   ;;  %s887_s5 = inlined_call_operand.vmem [shape: f32[1,32], index: 5, kind: input, shape index: {}]   ;;  %s888_s6 = inlined_call_operand.vmem [shape: f32[1,32], index: 6, kind: input, shape index: {}]   ;;  %s889_s7 = inlined_call_operand.vmem [shape: f32[1,128], index: 7, kind: input, shape index: {}]   ;;  %s890_s8 = inlined_call_operand.vmem [shape: f32[128,8], index: 8, kind: input, shape index: {}]   ;;  %s891_s9 = inlined_call_operand.vmem [shape: f32[8,4], index: 9, kind: input, shape index: {}]   ;;  %s892_s10 = inlined_call_operand.hbm [shape: f32[16,128], index: 10, kind: output, shape index: {0}]   ;;  %s893_s11 = inlined_call_operand.hbm [shape: f32[16,128], index: 11, kind: output, shape index: {1}]  }
   0x1   :  { %v580_v0 = vld [vmem:[%s883_s1] sm:$0xff] }
   0x2   :  { %v579_v1 = vld [vmem:[%s882_s0] sm:$0xff] }
   0x3   :  { %18 = vsyncpa [#allocation5], 0  ;;  %66 = vmatpush.bf16.msra.mxu0 %v580_v0  ;;  %vm55_vm0 = vcmask 130048   ;;  %v74_v2 = vld [vmem:[%s884_s2] sm:$0xf]  ;;  %vm83_vm1 = vcmask 1043456  }
   0x4   :  { %v85_v3 = vsel %vm83_vm1, %v74_v2, 0  ;;  %vm79_vm2 = vcmask 64512   ;;  %v591_v8 = vld [vmem:[%s887_s5] ss:$0 sm:$0xff]  ;;  %v582_v15 = vld [vmem:[%s885_s3 + $0x8] sm:$0xff]  ;;  %vm139_vm3 = vcmask 261120  }
   0x5   :  { %94 = vmatpush.bf16.msra.mxu1 %v85_v3  ;;  %149 = vmatpush.bf16.msra.mxu3 %v582_v15  ;;  %v581_v16 = vld [vmem:[%s885_s3] sm:$0xff]  ;;  %v584_v28 = vld [vmem:[%s886_s4 + $0x8] sm:$0xff]  ;;  %v764_v30 = vld [vmem:[%s890_s8 + $0x70] sm:$0xff]  ;;  %vm364_vm6 = vcmask 31744   ;;  %s505_s20 = sshll.u32 %s892_s10, 4  ;;  %s665_s21 = smov 128   ;;  %s506_s20 = int_to_ptr.hbm [resolvable:$true] %s505_s20 }
   0x6   :  { %543 = vmatmul.msk.bf16.vlgmr.msra.gmra.mxu0 %vm55_vm0, %v579_v1  ;;  %v592_v21 = vld [vmem:[%s888_s6] ss:$0 sm:$0xff]  ;;  %v769_v31 = vld [vmem:[%s890_s8 + $0x78] sm:$0xff]  ;;  %v781_v34 = vld [vmem:[%s890_s8 + $0x68] sm:$0xff]  ;;  %s666_s22 = smov 8   ;;  %s667_s0 = smov [#allocation4]  }
   0x7   :  { %v583_v29 = vld [vmem:[%s886_s4] sm:$0xff]  ;;  %v240_v33 = vpack.c.bf16 %v769_v31, %v764_v30  ;;  %v788_v36 = vld [vmem:[%s890_s8 + $0x50] sm:$0xff]  ;;  %v793_v37 = vld [vmem:[%s890_s8 + $0x58] sm:$0xff]  ;;  %s516_s1 = sshll.u32 %s667_s0, 4  ;;  %s518_s24 = sshll.u32 %s893_s11, 4  ;;  %s517_s1 = int_to_ptr.vmem [resolvable:$true] %s516_s1  ;;  %s519_s24 = int_to_ptr.hbm [resolvable:$true] %s518_s24 }
   0x8   :  { %v774_v32 = vld [vmem:[%s890_s8 + $0x60] sm:$0xff]  ;;  %v238_v38 = vpack.c.bf16 %v793_v37, %v788_v36  ;;  %v226_v40 = vld [vmem:[%s890_s8 + $0x48] sm:$0xff]  ;;  %v223_v45 = vld [vmem:[%s890_s8 + $0x30] sm:$0xff] }
   0x9   :  { %150 = vmatpush.bf16.msra.mxu3 %v581_v16  ;;  %204 = vmatpush.bf16.msrb.mxu1 %v584_v28  ;;  %v239_v35 = vpack.c.bf16 %v781_v34, %v774_v32  ;;  %v225_v39 = vld [vmem:[%s890_s8 + $0x40] sm:$0xff]  ;;  %v224_v46 = vld [vmem:[%s890_s8 + $0x38] sm:$0xff]  ;;  %v222_v49 = vld [vmem:[%s890_s8 + $0x28] sm:$0xff] }
   0xa   :  { %v237_v41 = vpack.c.bf16 %v226_v40, %v225_v39  ;;  %v236_v47 = vpack.c.bf16 %v224_v46, %v223_v45  ;;  %v221_v48 = vld [vmem:[%s890_s8 + $0x20] sm:$0xff]  ;;  %v219_v51 = vld [vmem:[%s890_s8 + $0x10] sm:$0xff]  ;;  %v220_v52 = vld [vmem:[%s890_s8 + $0x18] sm:$0xff]  ;;  %v266_v2 = vmul.f32 %v222_v49, %v222_v49 }
   0xb   :  { %v235_v50 = vpack.c.bf16 %v222_v49, %v221_v48  ;;  %v234_v53 = vpack.c.bf16 %v220_v52, %v219_v51  ;;  %v217_v54 = vld [vmem:[%s890_s8] sm:$0xff]  ;;  %v218_v55 = vld [vmem:[%s890_s8 + $0x8] sm:$0xff]  ;;  %v263_v57 = vmul.f32 %v219_v51, %v219_v51  ;;  %v264_v58 = vmul.f32 %v220_v52, %v220_v52 }
   0xc   :  { %v233_v56 = vpack.c.bf16 %v218_v55, %v217_v54  ;;  %v261_v59 = vmul.f32 %v217_v54, %v217_v54  ;;  %v262_v60 = vmul.f32 %v218_v55, %v218_v55  ;;  %v265_v61 = vmul.f32 %v221_v48, %v221_v48 }
   0xd   :  { %205 = vmatpush.bf16.msrb.mxu1 %v583_v29  ;;  %v280_v62 = vsel %vm79_vm2, %v263_v57, 0.0  ;;  %v282_v3 = vsel %vm79_vm2, %v264_v58, 0.0 }
   0xe   :  { %v277_v63 = vsel %vm79_vm2, %v261_v59, 0.0  ;;  %v278_v0 = vsel %vm79_vm2, %v262_v60, 0.0 }
  0x83   :  { %v68_v4 = vpop.f32.mrf.mxu0 }
  0x8b   :  { %v70_v5 = vpop.f32.mrf.mxu0 }
  0x8c   :  { %v73_v6 = vpack.c.bf16 %v70_v5, %v68_v4  ;;  %v267_v5 = vmul.f32 %v223_v45, %v223_v45  ;;  %v275_v45 = vmul.f32 %v764_v30, %v764_v30  ;;  %v334_v30 = vld [vmem:[%s891_s9] sm:$0xff]  ;;  %s664_s9 = smov [#allocation2]  }
  0x8d   :  { %356 = vmatpush.msrb.mxu3 %v334_v30  ;;  %s503_s17 = sshll.u32 %s664_s9, 4  ;;  %s504_s17 = int_to_ptr.vmem [resolvable:$true] %s503_s17 }
  0x8e   :  { %544 = vmatmul.msk.bf16.vlgmr.msra.gmra.mxu1 %vm79_vm2, %v73_v6  ;;  %v284_v6 = vsel %vm79_vm2, %v265_v61, 0.0  ;;  %v304_v48 = vsel %vm79_vm2, %v275_v45, 0.0 }
 0x10b   :  { %v96_v7 = vpop.f32.mrf.mxu1 }
 0x10c   :  { %v97_v9 = vadd.f32 %v591_v8, %v96_v7 }
 0x10e   :  { %v101_v12 = vmax.f32 %v97_v9, 0.0  ;;  %v286_v9 = vsel %vm79_vm2, %v266_v2, 0.0 }
 0x113   :  { %v98_v10 = vpop.f32.mrf.mxu1 }
 0x114   :  { %v99_v11 = vadd.f32 %v591_v8, %v98_v10  ;;  %v268_v8 = vmul.f32 %v224_v46, %v224_v46 }
 0x116   :  { %v102_v13 = vmax.f32 %v99_v11, 0.0  ;;  %v269_v11 = vmul.f32 %v225_v39, %v225_v39  ;;  %v290_v15 = vsel %vm79_vm2, %v268_v8, 0.0  ;;  %v272_v39 = vmul.f32 %v793_v37, %v793_v37 }
 0x117   :  { %v276_v37 = vmul.f32 %v769_v31, %v769_v31  ;;  %v662_v8 = vmov 1.0  }
 0x118   :  { %v103_v14 = vpack.c.bf16 %v102_v13, %v101_v12  ;;  %v288_v12 = vsel %vm79_vm2, %v267_v5, 0.0 }
 0x11a   :  { %111 = vmatpush.bf16.msra.mxu2 %v103_v14  ;;  %v270_v14 = vmul.f32 %v226_v40, %v226_v40  ;;  %v273_v40 = vmul.f32 %v774_v32, %v774_v32 }
 0x11c   :  { %v300_v46 = vsel %vm79_vm2, %v273_v40, 0.0 }
 0x11d   :  { %545 = vmatmul.msk.bf16.vlgmr.msra.gmra.mxu2 %vm55_vm0, %v579_v1 }
 0x11e   :  { %241 = vmatpush.bf16.msrb.mxu2 %v240_v33 }
 0x122   :  { %242 = vmatpush.bf16.msrb.mxu2 %v239_v35 }
 0x126   :  { %243 = vmatpush.bf16.msrb.mxu2 %v238_v38  ;;  %v271_v38 = vmul.f32 %v788_v36, %v788_v36 }
 0x12a   :  { %244 = vmatpush.bf16.msrb.mxu2 %v237_v41  ;;  %v296_v41 = vsel %vm79_vm2, %v271_v38, 0.0 }
 0x12e   :  { %245 = vmatpush.bf16.msrb.mxu2 %v236_v47 }
 0x132   :  { %246 = vmatpush.bf16.msrb.mxu2 %v235_v50 }
 0x136   :  { %247 = vmatpush.bf16.msrb.mxu2 %v234_v53 }
 0x13a   :  { %248 = vmatpush.bf16.msrb.mxu2 %v233_v56 }
 0x1a0   :  { %v113_v17 = vpop.f32.mrf.mxu2 }
 0x1a8   :  { %v115_v18 = vpop.f32.mrf.mxu2 }
 0x1a9   :  { %v118_v19 = vpack.c.bf16 %v115_v18, %v113_v17  ;;  %v292_v17 = vsel %vm79_vm2, %v269_v11, 0.0 }
 0x1ab   :  { %554 = vmatmul.msk.bf16.vlgmr.msra.gmra.mxu3 %vm139_vm3, %v118_v19  ;;  %v294_v19 = vsel %vm79_vm2, %v270_v14, 0.0 }
 0x22e   :  { %v152_v20 = vpop.f32.mrf.mxu3 }
 0x22f   :  { %v153_v22 = vadd.f32 %v592_v21, %v152_v20  ;;  %v593_v20 = vld [vmem:[%s889_s7] ss:$0 sm:$0xff] }
 0x231   :  { %v157_v25 = vmax.f32 %v153_v22, 0.0 }
 0x236   :  { %v154_v23 = vpop.f32.mrf.mxu3 }
 0x237   :  { %v155_v24 = vadd.f32 %v592_v21, %v154_v23 }
 0x239   :  { %v158_v26 = vmax.f32 %v155_v24, 0.0 }
 0x23b   :  { %v159_v27 = vpack.c.bf16 %v158_v26, %v157_v25 }
 0x23d   :  { %167 = vmatpush.bf16.msrb.mxu0 %v159_v27 }
 0x240   :  { %555 = vmatmul.msk.bf16.vlgmr.msrb.gmra.mxu0 %vm55_vm0, %v579_v1  ;;  %v279_v1 = vadd.f32 %v278_v0, %v277_v63 }
 0x242   :  { %v281_v4 = vadd.f32 %v280_v62, %v279_v1  ;;  %v387_v62 = vlaneseq }
 0x244   :  { %v283_v7 = vadd.f32 %v282_v3, %v281_v4  ;;  %v388_v0 = vshrl.u32 %v387_v62, 7  ;;  %v390_v1 = vand.u32 127, %v387_v62 }
 0x246   :  { %v285_v10 = vadd.f32 %v284_v6, %v283_v7  ;;  %v462_v5 = vadd.s32 8, %v388_v0  ;;  %vm391_vm5 = vcmp.eq.s32.totalorder %v390_v1, %v388_v0 }
 0x248   :  { %v287_v13 = vadd.f32 %v286_v9, %v285_v10  ;;  %vm463_vm4 = vcmp.eq.s32.totalorder %v390_v1, %v462_v5 }
 0x249   :  { %576 = vmatpush.msk.msra.mxu3 %vm463_vm4, %v662_v8 }
 0x24a   :  { %v289_v16 = vadd.f32 %v288_v12, %v287_v13 }
 0x24c   :  { %v291_v18 = vadd.f32 %v290_v15, %v289_v16 }
 0x24e   :  { %v293_v21 = vadd.f32 %v292_v17, %v291_v18 }
 0x250   :  { %v295_v23 = vadd.f32 %v294_v19, %v293_v21 }
 0x2bd   :  { %v169_v42 = vpop.f32.mrf.mxu0 }
 0x2c5   :  { %v171_v43 = vpop.f32.mrf.mxu0 }
 0x2c6   :  { %v174_v44 = vpack.c.bf16 %v171_v43, %v169_v42  ;;  %v274_v42 = vmul.f32 %v781_v34, %v781_v34  ;;  %v298_v43 = vsel %vm79_vm2, %v272_v39, 0.0  ;;  %v306_v34 = vsel %vm79_vm2, %v276_v37, 0.0 }
 0x2c8   :  { %564 = vmatmul.msk.bf16.vlgmr.msrb.gmra.mxu1 %vm139_vm3, %v174_v44  ;;  %v297_v44 = vadd.f32 %v296_v41, %v295_v23  ;;  %v302_v47 = vsel %vm79_vm2, %v274_v42, 0.0 }
 0x2ca   :  { %v299_v36 = vadd.f32 %v298_v43, %v297_v44  ;;  %v394_v44 = vadd.s32 4, %v388_v0 }
 0x2cc   :  { %v301_v32 = vadd.f32 %v300_v46, %v299_v36  ;;  %vm395_vm7 = vcmp.eq.s32.totalorder %v390_v1, %v394_v44 }
 0x2ce   :  { %v303_v49 = vadd.f32 %v302_v47, %v301_v32 }
 0x2d0   :  { %v305_v50 = vadd.f32 %v304_v48, %v303_v49 }
 0x2d2   :  { %v307_v51 = vadd.f32 %v306_v34, %v305_v50 }
 0x2d4   :  { %v308_v52 = vrot.slane %v307_v51, 4 }
 0x2d6   :  { %v309_v53 = vadd.f32 %v308_v52, %v307_v51 }
 0x2d8   :  { %v310_v54 = vrot.slane %v309_v53, 2 }
 0x2da   :  { %v311_v55 = vadd.f32 %v310_v54, %v309_v53 }
 0x2dc   :  { %v312_v31 = vrot.slane %v311_v55, 1 }
 0x2de   :  { %v313_v58 = vadd.f32 %v312_v31, %v311_v55 }
 0x345   :  { %v207_v22 = vpop.f32.mrf.mxu1 }
 0x346   :  { %v208_v24 = vadd.f32 %v593_v20, %v207_v22  ;;  %v663_v22 = vmov 0.0  }
 0x347   :  { %v567_v23 = vsel %vm391_vm5, 1.0, %v663_v22  ;;  %v568_v45 = vsel %vm395_vm7, 1.0, %v663_v22 }
 0x348   :  { %v212_v25 = vmax.f32 %v208_v24, 0.0  ;;  %572 = vmatpush.msk.msra.mxu1 %vm83_vm1, %v567_v23  ;;  %569 = vmatpush.msk.msra.mxu0 %vm83_vm1, %v568_v45 }
 0x34a   :  { %215 = vst [vmem:[#allocation2] sm:$0xff] %v212_v25  ;;  %v255_v26 = vmul.f32 %v212_v25, %v212_v25 }
 0x34c   :  { %257 = vadd.xlane.f32.xlu0 %v255_v26 }
 0x34d   :  { %v209_v27 = vpop.f32.mrf.mxu1 }
 0x34e   :  { %v210_v28 = vadd.f32 %v593_v20, %v209_v27 }
 0x350   :  { %v213_v29 = vmax.f32 %v210_v28, 0.0 }
 0x352   :  { %216 = vst [vmem:[#allocation2 + $0x8] sm:$0xff] %v213_v29  ;;  %v256_v33 = vmul.f32 %v213_v29, %v213_v29  ;;  %v214_v35 = vpack.c.bf16 %v213_v29, %v212_v25 }
 0x353   :  { %511 = dma.vmem_to_hbm [thread:$0]  %s504_s17, 256, %s506_s20, [#allocation3], %s665_s21, %s665_s21, %s666_s22  }
 0x354   :  { %259 = vadd.xlane.f32.xlu0 %v256_v33  ;;  %249 = vmatmul.bf16.vlgmr.msrb.gmra.mxu2 %v214_v35 }
 0x3bf   :  { %v258_v56 = vpop.xlane.xlu0 %257 }
 0x3c7   :  { %v260_v6 = vpop.xlane.xlu0 %259 }
 0x3d7   :  { %v250_v57 = vpop.f32.mrf.mxu2 }
 0x3d8   :  { %v314_v59 = vmul.f32 -2.0, %v250_v57 }
 0x3da   :  { %v316_v60 = vadd.f32 %v314_v59, %v258_v56 }
 0x3dc   :  { %v318_v61 = vadd.f32 %v316_v60, %v313_v58 }
 0x3de   :  { %v320_v63 = vmax.f32 %v318_v61, 0.0 }
 0x3df   :  { %v252_v2 = vpop.f32.mrf.mxu2 }
 0x3e0   :  { %v324_v3 = vadd.f32 0.0001, %v320_v63  ;;  %v315_v4 = vmul.f32 -2.0, %v252_v2  ;;  %v322_v11 = vadd.f32 1.0, %v320_v63 }
 0x3e2   :  { %594 = vrcp.f32 %v324_v3  ;;  %v317_v7 = vadd.f32 %v315_v4, %v260_v6 }
 0x3e4   :  { %v319_v9 = vadd.f32 %v317_v7, %v313_v58 }
 0x3e6   :  { %v321_v10 = vmax.f32 %v319_v9, 0.0 }
 0x3e8   :  { %v595_v12 = vpop.eup %594  ;;  %v325_v13 = vadd.f32 0.0001, %v321_v10  ;;  %v323_v15 = vadd.f32 1.0, %v321_v10 }
 0x3e9   :  { %v328_v14 = vmul.f32 %v595_v12, %v322_v11 }
 0x3ea   :  { %596 = vrcp.f32 %v325_v13 }
 0x3eb   :  { %598 = vlog2.f32 %v328_v14 }
 0x3f0   :  { %v597_v16 = vpop.eup %596 }
 0x3f1   :  { %v599_v17 = vpop.eup %598  ;;  %v329_v18 = vmul.f32 %v597_v16, %v323_v15 }
 0x3f2   :  { %v331_v19 = vmul.f32 0.6931472, %v599_v17 }
 0x3f3   :  { %600 = vlog2.f32 %v329_v18 }
 0x3f4   :  { %565 = vmatmul.msk.f32.vlgmr.msrb.gmra.mxu3 %vm79_vm2, %v331_v19 }
 0x3f9   :  { %v601_v20 = vpop.eup %600 }
 0x3fa   :  { %v333_v21 = vmul.f32 0.6931472, %v601_v20 }
 0x3fc   :  { %566 = vmatmul.msk.f32.gmra.mxu3 %vm79_vm2, %v333_v21 }
 0x404   :  { %577 = vmatmul.msk.f32.vlgmr.msra.gmra.mxu3 %vm79_vm2, %v320_v63 }
 0x40c   :  { %578 = vmatmul.msk.f32.gmra.mxu3 %vm79_vm2, %v321_v10 }
 0x477   :  { %v358_v24 = vpop.f32.mrf.mxu3 }
 0x478   :  { %573 = vmatmul.msk.f32.vlgmr.msra.gmra.mxu1 %vm364_vm6, %v358_v24  ;;  %v365_v25 = vsel %vm364_vm6, %v358_v24, -inf }
 0x479   :  { %366 = vmax.xlane.f32.xlu1 %v365_v25 }
 0x47f   :  { %v361_v26 = vpop.f32.mrf.mxu3 }
 0x480   :  { %574 = vmatmul.msk.f32.gmra.mxu1 %vm364_vm6, %v361_v26  ;;  %v368_v27 = vsel %vm364_vm6, %v361_v26, -inf }
 0x481   :  { %369 = vmax.xlane.f32.xlu1 %v368_v27 }
 0x487   :  { %v489_v34 = vpop.f32.mrf.mxu3 }
 0x48f   :  { %v492_v55 = vpop.f32.mrf.mxu3 }
 0x4ec   :  { %v367_v28 = vpop.xlane.xlu1 %366 }
 0x4ed   :  { %v371_v29 = vsub.f32 %v358_v24, %v367_v28 }
 0x4ef   :  { %v373_v33 = vmul.f32 1.442695, %v371_v29 }
 0x4f1   :  { %602 = vpow2.f32 %v373_v33 }
 0x4f4   :  { %v370_v35 = vpop.xlane.xlu1 %369 }
 0x4f5   :  { %v372_v38 = vsub.f32 %v361_v26, %v370_v35  ;;  %v456_v49 = vpop.f32.mrf.mxu1 }
 0x4f7   :  { %v603_v39 = vpop.eup %602  ;;  %v375_v40 = vmul.f32 1.442695, %v372_v38 }
 0x4f8   :  { %v377_v41 = vsel %vm364_vm6, %v603_v39, 0.0 }
 0x4f9   :  { %604 = vpow2.f32 %v375_v40  ;;  %378 = vadd.xlane.f32.xlu2 %v377_v41 }
 0x4fd   :  { %v459_v53 = vpop.f32.mrf.mxu1 }
 0x4ff   :  { %v605_v42 = vpop.eup %604 }
 0x500   :  { %v380_v43 = vsel %vm364_vm6, %v605_v42, 0.0 }
 0x501   :  { %381 = vadd.xlane.f32.xlu2 %v380_v43 }
 0x56c   :  { %v379_v46 = vpop.xlane.xlu2 %378 }
 0x56d   :  { %606 = vrcp.f32 %v379_v46 }
 0x573   :  { %v607_v36 = vpop.eup %606 }
 0x574   :  { %v385_v37 = vmul.f32 %v607_v36, %v603_v39  ;;  %v382_v47 = vpop.xlane.xlu2 %381 }
 0x575   :  { %608 = vrcp.f32 %v382_v47 }
 0x576   :  { %570 = vmatmul.msk.f32.vlgmr.msra.gmra.mxu0 %vm364_vm6, %v385_v37 }
 0x57b   :  { %v609_v32 = vpop.eup %608 }
 0x57c   :  { %v386_v48 = vmul.f32 %v609_v32, %v605_v42 }
 0x57e   :  { %571 = vmatmul.msk.f32.gmra.mxu0 %vm364_vm6, %v386_v48 }
 0x5f3   :  { %v424_v50 = vpop.f32.mrf.mxu0 }
 0x5f4   :  { %v457_v51 = vadd.f32 %v456_v49, %v424_v50 }
 0x5f6   :  { %v495_v52 = vadd.f32 %v489_v34, %v457_v51 }
 0x5f8   :  { %497 = vst [vmem:[#allocation4] sm:$0xff] %v495_v52 }
 0x5fb   :  { %v427_v30 = vpop.f32.mrf.mxu0 }
 0x5fc   :  { %v460_v54 = vadd.f32 %v459_v53, %v427_v30 }
 0x5fe   :  { %v496_v31 = vadd.f32 %v492_v55, %v460_v54 }
 0x600   :  { %498 = vst [vmem:[#allocation4 + $0x8] sm:$0xff] %v496_v31 }
 0x601   :  { %524 = dma.vmem_to_hbm [thread:$0]  %s517_s1, 256, %s519_s24, [#allocation5], %s665_s21, %s665_s21, %s666_s22  }
 0x602   :  { %658 = dma.done.wait [#allocation3], 256  }
 0x603   :  { %659 = vsyncadd [#allocation3], 4294967040 }
 0x604   :  { %660 = dma.done.wait [#allocation5], 256  }
 0x605   :  { %661 = vsyncadd [#allocation5], 4294967040 }
 0x606   :  { %533 = vsyncpa [#allocation3], 1 }
 0x607   :  { %534 = vsyncpa [#allocation5], 1 }

</bundles_post_ra>
